<compile_context>
chip_gen: v5e
topology: v5e:2x2
jax: 0.10.0
libtpu: 0.0.40
codegen_flags: <defaults>
</compile_context>

<pallas_src>
import jax
import jax.numpy as jnp
from jax.experimental import pallas as pl
from jax.experimental.pallas import tpu as pltpu

PART = 6          # PCB number of horizontal parts (model.part)
BN_EPS = 1e-3     # EfficientNet BatchNorm eps


def _round_up(x, m):
    return ((x + m - 1) // m) * m


# ---------------------------------------------------------------------------
# Fused kernel (per grid step = one image x one pooling bin):
#   x_ref: (1, MPAD, 4*CIN)  bf16 flattened space-to-depth image (whole image,
#                            resident across the PART axis)
#   w_ref: (4, 4*CIN, COUT)  bf16 conv weights (BN scale folded), one matrix
#                            per 2x2 tap of the s2d-space conv
#   b_ref: (1, COUT)         f32  folded BN bias
#   o_ref: (1, 1, COUT)      f32  pooled output of this (image, bin)
# ---------------------------------------------------------------------------
def _make_kernel(bin_h, ow, ow8, cin4, cout, win_rows):
    row_stride = bin_h * ow8          # flat s2d rows per pooling bin (mult of 8)
    m_slice = bin_h * ow8             # rows fed to each tap matmul
    inv_count = 1.0 / float(bin_h * ow)

    def kernel(x_ref, w_ref, b_ref, o_ref):
        p = pl.program_id(1)
        # One aligned dynamic load of the bin's window; tap shifts are static.
        base = pl.multiple_of(p * row_stride, 8)
        win = x_ref[0, pl.ds(base, win_rows), :]              # (win_rows, 4*CIN)

        acc = jnp.zeros((m_slice, cout), jnp.float32)
        # 2x2 stride-1 conv over the s2d image == 3x3 stride-2 conv on the input.
        for di in range(2):
            for dj in range(2):
                off = di * ow8 + dj                            # static offset
                tap = win[off:off + m_slice, :]                # (m_slice, 4*CIN)
                acc = acc + jnp.dot(tap, w_ref[2 * di + dj],
                                    preferred_element_type=jnp.float32)

        y = acc + b_ref[...]                                   # folded BN bias
        y = y * jax.nn.sigmoid(y)                              # SiLU (EUP), f32

        # Mask the phantom rows coming from per-row padding (cols ow..ow8-1),
        # then average over the bin's bin_h*ow valid output pixels.
        col = jax.lax.broadcasted_iota(jnp.int32, (m_slice, 1), 0) % ow8
        y = jnp.where(col < ow, y, 0.0)
        pooled = jnp.sum(y, axis=0) * inv_count                # (COUT,)
        o_ref[...] = pooled[None, None, :].astype(o_ref.dtype)

    return kernel


def pcb_effi_test_forward(x_nchw, conv_w, bn_gamma, bn_beta, bn_mean, bn_var,
                          part=PART):
    n, cin, h, w = x_nchw.shape
    cout, _, kh, kw = conv_w.shape
    assert (kh, kw) == (3, 3), "stem conv is 3x3"
    assert h % 2 == 0 and w % 2 == 0, "stem assumes even input H/W"
    oh, ow = h // 2, w // 2                      # stride-2, pad-1 output size
    assert oh % part == 0, "assumes OH divisible by part (uniform bins)"
    bin_h = oh // part
    cin4 = 4 * cin                               # s2d channels (2x2 phases x cin)
    ow8 = _round_up(ow + 1, 8)                   # s2d cols per row, sublane-padded
    mtot = (oh + 1) * ow8                        # flat s2d rows (real data)
    win_rows = _round_up((bin_h + 1) * ow8 + 1, 8)   # rows one bin's window needs
    mpad = (part - 1) * bin_h * ow8 + win_rows   # total rows incl. zero tail
    m_slice = bin_h * ow8

    # ---- space-to-depth repack of the padded image (same bytes as raw) -----
    xp = jnp.pad(x_nchw.astype(jnp.float32), ((0, 0), (0, 0), (1, 1), (1, 1)))
    xs = xp.reshape(n, cin, oh + 1, 2, ow + 1, 2)            # (n,ci,R,pi,C,pj)
    xs = jnp.transpose(xs, (0, 2, 4, 3, 5, 1))               # (n,R,C,pi,pj,ci)
    xs = xs.reshape(n, oh + 1, ow + 1, cin4)
    xs = jnp.pad(xs, ((0, 0), (0, 0), (0, ow8 - (ow + 1)), (0, 0)))
    xs = xs.reshape(n, (oh + 1) * ow8, cin4)
    xs = jnp.pad(xs, ((0, 0), (0, mpad - mtot), (0, 0))).astype(jnp.bfloat16)

    # ---- fold BN scale into the weight; 3x3 kernel -> four 2x2-tap matrices -
    scale = bn_gamma * jax.lax.rsqrt(bn_var + BN_EPS)                 # (COUT,)
    w_f = conv_w.astype(jnp.float32) * scale[:, None, None, None]     # (o,ci,3,3)
    w_p = jnp.pad(w_f, ((0, 0), (0, 0), (0, 1), (0, 1)))              # (o,ci,4,4)
    w_p = w_p.reshape(cout, cin, 2, 2, 2, 2)                          # (o,ci,di,pi,dj,pj)
    w_taps = jnp.transpose(w_p, (2, 4, 3, 5, 1, 0))                   # (di,dj,pi,pj,ci,o)
    w_taps = w_taps.reshape(4, cin4, cout).astype(jnp.bfloat16)
    bias = (bn_beta - bn_mean * scale).reshape(1, cout).astype(jnp.float32)

    kernel = _make_kernel(bin_h, ow, ow8, cin4, cout, win_rows)

    cost = pl.CostEstimate(
        flops=2 * n * part * 4 * m_slice * cin4 * cout,
        transcendentals=n * part * m_slice * cout,
        bytes_accessed=(n * mpad * cin4) * 2 + (4 * cin4 * cout) * 2
                       + cout * 4 + (n * part * cout) * 4)

    out = pl.pallas_call(
        kernel,
        out_shape=jax.ShapeDtypeStruct((n * part, 1, cout), jnp.float32),
        grid_spec=pltpu.PrefetchScalarGridSpec(
            num_scalar_prefetch=0,
            grid=(n, part),
            in_specs=[
                # whole s2d image per batch; re-DMA'd only when b changes
                pl.BlockSpec((1, mpad, cin4), lambda b, p: (b, 0, 0)),
                pl.BlockSpec((4, cin4, cout), lambda b, p: (0, 0, 0)),
                pl.BlockSpec((1, cout), lambda b, p: (0, 0)),
            ],
            out_specs=pl.BlockSpec((1, 1, cout),
                                   lambda b, p: (b * part + p, 0, 0)),
        ),
        compiler_params=pltpu.CompilerParams(
            dimension_semantics=("parallel", "parallel"),
            vmem_limit_bytes=32 * 1024 * 1024),
        cost_estimate=cost,
    )(xs, w_taps, bias)

    pooled = out.reshape(n, part, cout)          # (N, part, C)
    # PyTorch: x.view(N, C, part)
    return jnp.transpose(pooled, (0, 2, 1))


# ---------------------------------------------------------------------------
# Pure-JAX reference (f32) for a numerical sanity check.
# ---------------------------------------------------------------------------
def _reference(x_nchw, conv_w, g, b, mu, var, part=PART):
    y = jax.lax.conv_general_dilated(
        x_nchw.astype(jnp.float32), conv_w.astype(jnp.float32),
        window_strides=(2, 2), padding=((1, 1), (1, 1)),
        dimension_numbers=("NCHW", "OIHW", "NCHW"))
    scale = g * jax.lax.rsqrt(var + BN_EPS)
    y = y * scale[None, :, None, None] + (b - mu * scale)[None, :, None, None]
    y = y * jax.nn.sigmoid(y)                       # swish
    n, c, oh, ow = y.shape
    return y.reshape(n, c, part, oh // part, ow).mean(axis=(3, 4))  # (N, C, part)


if __name__ == "__main__":
    key = jax.random.PRNGKey(0)
    k0, k1, k2, k3, k4, k5 = jax.random.split(key, 6)

    # Small shapes: batch=2, 3-channel 24x24 image -> stem conv s2 -> 12x12,
    # part=6 -> pooling bins of height 2.  Stem output channels = 16.
    N, CIN, H, W = 2, 3, 24, 24
    COUT = 16

    x = jax.random.normal(k0, (N, CIN, H, W), jnp.float32)
    conv_w = 0.1 * jax.random.normal(k1, (COUT, CIN, 3, 3), jnp.float32)
    bn_gamma = 1.0 + 0.1 * jax.random.normal(k2, (COUT,), jnp.float32)
    bn_beta = 0.1 * jax.random.normal(k3, (COUT,), jnp.float32)
    bn_mean = 0.1 * jax.random.normal(k4, (COUT,), jnp.float32)
    bn_var = 0.5 + jnp.abs(jax.random.normal(k5, (COUT,), jnp.float32))

    y = pcb_effi_test_forward(x, conv_w, bn_gamma, bn_beta, bn_mean, bn_var)
    y = jax.block_until_ready(y)

    y_ref = _reference(x, conv_w, bn_gamma, bn_beta, bn_mean, bn_var)
    assert y.shape == (N, COUT, PART), y.shape
    # bf16 matmul inputs -> slightly looser tolerance than pure-f32.
    assert jnp.allclose(y, y_ref, rtol=2e-2, atol=2e-2), "mismatch vs reference"

    print("KERNEL_OK")
</pallas_src>

<mosaic_0001>
module attributes {stable_mosaic.version = 11 : i64} {
  func.func @kernel(%arg0: i32, %arg1: i32, %arg2: memref<1x216x12xbf16, #tpu.memory_space<vmem>>, %arg3: memref<4x12x16xbf16, #tpu.memory_space<vmem>>, %arg4: memref<1x16xf32, #tpu.memory_space<vmem>>, %arg5: memref<1x1x16xf32, #tpu.memory_space<vmem>>) attributes {dimension_semantics = [#tpu.dimension_semantics<parallel>, #tpu.dimension_semantics<parallel>], iteration_bounds = array<i64: 2, 6>, scalar_prefetch = 0 : i64, scratch_operands = 0 : i64, tpu.core_type = #tpu.core_type<tc>, window_params = [{transform_indices = @transform_0, window_bounds = array<i64: 1, 216, 12>}, {pipeline_mode = #tpu.pipeline_mode<synchronous>, transform_indices = @transform_1, window_bounds = array<i64: 4, 12, 16>}, {pipeline_mode = #tpu.pipeline_mode<synchronous>, transform_indices = @transform_2, window_bounds = array<i64: 1, 16>}, {transform_indices = @transform_3, window_bounds = array<i64: 1, 1, 16>}]} {
    %c32_i32 = arith.constant 32 : i32
    %0 = arith.muli %arg1, %c32_i32 : i32
    %1 = tpu.assume_multiple %0, 8 : i32
    %c0 = arith.constant 0 : index
    %2 = arith.index_cast %1 : i32 to index
    %c0_0 = arith.constant 0 : index
    %3 = vector.load %arg2[%c0, %2, %c0_0] : memref<1x216x12xbf16, #tpu.memory_space<vmem>>, vector<1x56x12xbf16>
    %4 = vector.shape_cast %3 : vector<1x56x12xbf16> to vector<56x12xbf16>
    %cst = arith.constant 0.000000e+00 : f32
    %5 = vector.broadcast %cst : f32 to vector<32x16xf32>
    %6 = vector.extract_strided_slice %4 {offsets = [0, 0], sizes = [32, 12], strides = [1, 1]} : vector<56x12xbf16> to vector<32x12xbf16>
    %c0_1 = arith.constant 0 : index
    %c0_2 = arith.constant 0 : index
    %c0_3 = arith.constant 0 : index
    %7 = vector.load %arg3[%c0_1, %c0_2, %c0_3] : memref<4x12x16xbf16, #tpu.memory_space<vmem>>, vector<1x12x16xbf16>
    %8 = vector.shape_cast %7 : vector<1x12x16xbf16> to vector<12x16xbf16>
    %cst_4 = arith.constant dense<0.000000e+00> : vector<32x16xf32>
    %9 = tpu.matmul %6, %8, %cst_4 {dimension_numbers = #tpu.dot_dimension_numbers<[1], [0], [0], [1], [0, 0, 1, 1], [], []>} : vector<32x12xbf16>, vector<12x16xbf16>, vector<32x16xf32> -> vector<32x16xf32>
    %10 = arith.addf %5, %9 : vector<32x16xf32>
    %11 = vector.extract_strided_slice %4 {offsets = [1, 0], sizes = [32, 12], strides = [1, 1]} : vector<56x12xbf16> to vector<32x12xbf16>
    %c1 = arith.constant 1 : index
    %c0_5 = arith.constant 0 : index
    %c0_6 = arith.constant 0 : index
    %12 = vector.load %arg3[%c1, %c0_5, %c0_6] : memref<4x12x16xbf16, #tpu.memory_space<vmem>>, vector<1x12x16xbf16>
    %13 = vector.shape_cast %12 : vector<1x12x16xbf16> to vector<12x16xbf16>
    %cst_7 = arith.constant dense<0.000000e+00> : vector<32x16xf32>
    %14 = tpu.matmul %11, %13, %cst_7 {dimension_numbers = #tpu.dot_dimension_numbers<[1], [0], [0], [1], [0, 0, 1, 1], [], []>} : vector<32x12xbf16>, vector<12x16xbf16>, vector<32x16xf32> -> vector<32x16xf32>
    %15 = arith.addf %10, %14 : vector<32x16xf32>
    %16 = vector.extract_strided_slice %4 {offsets = [16, 0], sizes = [32, 12], strides = [1, 1]} : vector<56x12xbf16> to vector<32x12xbf16>
    %c2 = arith.constant 2 : index
    %c0_8 = arith.constant 0 : index
    %c0_9 = arith.constant 0 : index
    %17 = vector.load %arg3[%c2, %c0_8, %c0_9] : memref<4x12x16xbf16, #tpu.memory_space<vmem>>, vector<1x12x16xbf16>
    %18 = vector.shape_cast %17 : vector<1x12x16xbf16> to vector<12x16xbf16>
    %cst_10 = arith.constant dense<0.000000e+00> : vector<32x16xf32>
    %19 = tpu.matmul %16, %18, %cst_10 {dimension_numbers = #tpu.dot_dimension_numbers<[1], [0], [0], [1], [0, 0, 1, 1], [], []>} : vector<32x12xbf16>, vector<12x16xbf16>, vector<32x16xf32> -> vector<32x16xf32>
    %20 = arith.addf %15, %19 : vector<32x16xf32>
    %21 = vector.extract_strided_slice %4 {offsets = [17, 0], sizes = [32, 12], strides = [1, 1]} : vector<56x12xbf16> to vector<32x12xbf16>
    %c3 = arith.constant 3 : index
    %c0_11 = arith.constant 0 : index
    %c0_12 = arith.constant 0 : index
    %22 = vector.load %arg3[%c3, %c0_11, %c0_12] : memref<4x12x16xbf16, #tpu.memory_space<vmem>>, vector<1x12x16xbf16>
    %23 = vector.shape_cast %22 : vector<1x12x16xbf16> to vector<12x16xbf16>
    %cst_13 = arith.constant dense<0.000000e+00> : vector<32x16xf32>
    %24 = tpu.matmul %21, %23, %cst_13 {dimension_numbers = #tpu.dot_dimension_numbers<[1], [0], [0], [1], [0, 0, 1, 1], [], []>} : vector<32x12xbf16>, vector<12x16xbf16>, vector<32x16xf32> -> vector<32x16xf32>
    %25 = arith.addf %20, %24 : vector<32x16xf32>
    %c0_14 = arith.constant 0 : index
    %c0_15 = arith.constant 0 : index
    %26 = vector.load %arg4[%c0_14, %c0_15] : memref<1x16xf32, #tpu.memory_space<vmem>>, vector<1x16xf32>
    %27 = vector.broadcast %26 : vector<1x16xf32> to vector<32x16xf32>
    %28 = arith.addf %25, %27 : vector<32x16xf32>
    %29 = arith.negf %28 : vector<32x16xf32>
    %30 = math.exp %29 : vector<32x16xf32>
    %cst_16 = arith.constant 1.000000e+00 : f32
    %31 = vector.broadcast %cst_16 : f32 to vector<32x16xf32>
    %32 = arith.addf %31, %30 : vector<32x16xf32>
    %33 = arith.divf %31, %32 : vector<32x16xf32>
    %34 = arith.mulf %28, %33 : vector<32x16xf32>
    %35 = tpu.iota {dimensions = array<i32: 0>} : vector<32x1xi32>
    %c16_i32 = arith.constant 16 : i32
    %c0_i32 = arith.constant 0 : i32
    %36 = arith.cmpi eq, %c16_i32, %c0_i32 : i32
    %c1_i32 = arith.constant 1 : i32
    %37 = arith.select %36, %c1_i32, %c16_i32 : i32
    %38 = vector.broadcast %37 : i32 to vector<32x1xi32>
    %39 = arith.remsi %35, %38 : vector<32x1xi32>
    %c0_i32_17 = arith.constant 0 : i32
    %40 = vector.broadcast %c0_i32_17 : i32 to vector<32x1xi32>
    %41 = arith.cmpi ne, %39, %40 : vector<32x1xi32>
    %c0_i32_18 = arith.constant 0 : i32
    %42 = vector.broadcast %c0_i32_18 : i32 to vector<32x1xi32>
    %43 = arith.cmpi slt, %39, %42 : vector<32x1xi32>
    %c0_i32_19 = arith.constant 0 : i32
    %44 = arith.cmpi slt, %37, %c0_i32_19 : i32
    %45 = vector.broadcast %44 : i1 to vector<32x1xi1>
    %46 = vector.broadcast %45 : vector<32x1xi1> to vector<32x1xi1>
    %47 = arith.xori %43, %46 : vector<32x1xi1>
    %48 = arith.andi %47, %41 : vector<32x1xi1>
    %49 = vector.broadcast %37 : i32 to vector<32x1xi32>
    %50 = arith.addi %39, %49 : vector<32x1xi32>
    %51 = arith.select %48, %50, %39 : vector<32x1xi1>, vector<32x1xi32>
    %c12_i32 = arith.constant 12 : i32
    %52 = vector.broadcast %c12_i32 : i32 to vector<32x1xi32>
    %53 = arith.cmpi slt, %51, %52 : vector<32x1xi32>
    %cst_20 = arith.constant 0.000000e+00 : f32
    %54 = vector.shape_cast %53 : vector<32x1xi1> to vector<32x1xi1>
    %55 = vector.broadcast %54 : vector<32x1xi1> to vector<32x16xi1>
    %56 = vector.broadcast %cst_20 : f32 to vector<32x16xf32>
    %57 = arith.select %55, %34, %56 : vector<32x16xi1>, vector<32x16xf32>
    %cst_21 = arith.constant dense<0.000000e+00> : vector<16xf32>
    %58 = vector.multi_reduction <add>, %57, %cst_21 [0] : vector<32x16xf32> to vector<16xf32>
    %cst_22 = arith.constant 0.0416666679 : f32
    %59 = vector.broadcast %cst_22 : f32 to vector<16xf32>
    %60 = arith.mulf %58, %59 : vector<16xf32>
    %61 = vector.shape_cast %60 : vector<16xf32> to vector<1x1x16xf32>
    %c0_23 = arith.constant 0 : index
    %c0_24 = arith.constant 0 : index
    %c0_25 = arith.constant 0 : index
    %62 = vector.load %arg5[%c0_23, %c0_24, %c0_25] : memref<1x1x16xf32, #tpu.memory_space<vmem>>, vector<1x1x16xf32>
    tpu.vector_store %arg5[%c0_23, %c0_24, %c0_25], %61 {strides = array<i32>} : memref<1x1x16xf32, #tpu.memory_space<vmem>>, vector<1x1x16xf32>,
    return
  }
  func.func @transform_0(%arg0: i32, %arg1: i32) -> (i32, i32, i32) {
    %c0_i32 = arith.constant 0 : i32
    %c0_i32_0 = arith.constant 0 : i32
    %c0_i32_1 = arith.constant 0 : i32
    return %arg0, %c0_i32, %c0_i32_0 : i32, i32, i32
  }
  func.func @transform_1(%arg0: i32, %arg1: i32) -> (i32, i32, i32) {
    %c0_i32 = arith.constant 0 : i32
    %c0_i32_0 = arith.constant 0 : i32
    %c0_i32_1 = arith.constant 0 : i32
    %c0_i32_2 = arith.constant 0 : i32
    return %c0_i32, %c0_i32_0, %c0_i32_1 : i32, i32, i32
  }
  func.func @transform_2(%arg0: i32, %arg1: i32) -> (i32, i32) {
    %c0_i32 = arith.constant 0 : i32
    %c0_i32_0 = arith.constant 0 : i32
    %c0_i32_1 = arith.constant 0 : i32
    return %c0_i32, %c0_i32_0 : i32, i32
  }
  func.func @transform_3(%arg0: i32, %arg1: i32) -> (i32, i32, i32) {
    %c6_i32 = arith.constant 6 : i32
    %0 = arith.muli %arg0, %c6_i32 : i32
    %1 = arith.addi %0, %arg1 : i32
    %c0_i32 = arith.constant 0 : i32
    %c0_i32_0 = arith.constant 0 : i32
    %c0_i32_1 = arith.constant 0 : i32
    return %1, %c0_i32, %c0_i32_0 : i32, i32, i32
  }
}

</mosaic_0001>

<bundles_post_ra>
// kernel: tpu_custom_call.1
= control target key start
LH: loop header
LB: loop body
LE: loop exit
PB: predicated region body
PF: predicated region fallthrough
CT: control target
= control target key end

     0   :  { %8 = vsyncpa [#allocation3], 0  ;;  %s1135_s0 = inlined_call_operand.vmem [shape: bf16[2,216,12], index: 0, kind: input, shape index: {}]   ;;  %s1136_s1 = inlined_call_operand.vmem [shape: bf16[4,12,16], index: 1, kind: input, shape index: {}]   ;;  %s1137_s2 = inlined_call_operand.vmem [shape: f32[1,16], index: 2, kind: input, shape index: {}]   ;;  %s1138_s3 = inlined_call_operand.hbm [shape: f32[12,1,16], index: 3, kind: output, shape index: {}]  }
   0x1   :  { %10 = vsyncpa [#allocation3 + $0x1], 0  ;;  %s926_s12 = smov 0   ;;  %s928_s13 = smov 0  }
   0x2   :  { %s930_s14 = smov 0   ;;  %s932_s15 = smov 0  }
   0x3   :  { %s934_s16 = smov 0   ;;  %s936_s17 = smov 0  }
   0x4   :  { %s938_s18 = smov 0   ;;  %s940_s19 = smov 0  }
   0x5 LB: > { %s658_s20 = sadd.s32 4294967295, %s904_s19   ;;  %s25_s21 = sadd.s32 1, %s896_s17  ;;  %s904_s19 = sphi %s940_s19, %s16_s19   ;;  %s900_s18 = sphi %s938_s18, %s1153_s18   ;;  %s896_s17 = sphi %s936_s17, %s1152_s17   ;;  %s892_s16 = sphi %s934_s16, %s1151_s16   ;;  %s888_s15 = sphi %s932_s15, %s1150_s15   ;;  %s884_s14 = sphi %s930_s14, %s1149_s14   ;;  %s880_s13 = sphi %s928_s13, %s1148_s13   ;;  %s876_s12 = sphi %s926_s12, %s1147_s12  }
   0x6   : > { %s28_s22 = sadd.s32 1, %s900_s18  ;;  %p26_p0 = scmp.ge.s32.totalorder %s25_s21, 6 }
   0x7   : > { %s100_s23 = smul.u32 6, %s900_s18  ;;  %s659_s24 = sadd.s32 4294967294, %s904_s19  }
   0x8   : > { %p117_p1 = scmp.ne.s32.totalorder %s884_s14, %s880_s13  ;;  %s1155_s21 = smov (%p26_p0, %s25_s21), 0 }
   0x9   : > { %s1157_s22 = smov (!%p26_p0, %s28_s22), %s900_s18  ;;  %s101_s25 = sadd.s32 %s896_s17, %s100_s23 }
   0xa   : > { %p118_p2 = scmp.eq.s32.totalorder %s658_s20, 11  ;;  %p30_p3 = scmp.ge.s32.totalorder %s1157_s22, 2 }
   0xb   : > { %p123_p4 = scmp.ne.s32.totalorder %s880_s13, %s876_s12  ;;  %p124_p6 = scmp.eq.s32.totalorder %s659_s24, 11 }
   0xc   : > { %p979_p5 = por %p118_p2, %p117_p1  ;;  %s1159_s22 = smov (%p30_p3, %s1157_s22), 0 }
   0xd   : > { %p985_p7 = por %p124_p6, %p123_p4  ;;  %p662_p8 = scmp.ge.s32.totalorder %s904_s19, 1 }
   0xe   : > { %s102_s28 = smul.u32 6, %s1159_s22  ;;  %p156_p9 = scmp.lt.s32.totalorder %s904_s19, 13 }
   0xf   : > { %s107_s4 = sadd.s32 1, %s884_s14 }
  0x10   : > { %s103_s29 = sadd.s32 %s102_s28, %s1155_s21  ;;  %p157_p10 = pnand %p662_p8, %p156_p9 }
  0x11   : > { %s104_s30 = ssub.s32 %s101_s25, %s103_s29  ;;  %p179_p12 = scmp.lt.s32.totalorder (!%p157_p10), %s892_s16, 1 }
  0x12   : > { %p105_p11 = scmp.eq.s32.totalorder %s104_s30, 0  ;;  %160 = sbr.rel (%p157_p10) target bundleno = 249 (0xf9), region = 32 }
  0x13   : > { %s664_s24 = sshll.u32 (!%p157_p10), %s888_s15, 5 }
  0x14   : > { %s995_s5 = scalar_select %p105_p11, %s884_s14, %s107_s4  }
  0x15   : > { %s188_s6 = sshra.s32 (!%p157_p10), %s664_s24, 3  ;;  %s580_s4 = smul.u32 (!%p157_p10), 6, %s892_s16 }
  0x16   : > { %s665_s20 = sshll.u32 (!%p157_p10), %s188_s6, 2  ;;  %s177_s6 = sand.u32 (!%p157_p10), 1, %s880_s13  }
  0x17   : > { %vm250_vm0 = vcmask 1045504   ;;  %v692_v0 = vld [vmem:[%s1136_s1 + $0x10] sm:$0xf]  ;;  %v714_v1 = vld [vmem:[%s1136_s1 + $0x10] sm:$0x30]  ;;  %s180_s25 = scalar_select %p179_p12, %s892_s16, 1 }
  0x18   : > { %v693_v2 = vor.u32 %v714_v1, %v692_v0  ;;  %v684_v3 = vld [vmem:[%s1136_s1] sm:$0xf]  ;;  %v712_v4 = vld [vmem:[%s1136_s1] sm:$0x30]  ;;  %v678_v6 = vld [vmem:[%s1136_s1 + $0x8] sm:$0xf]  ;;  %s581_s7 = sadd.s32 %s888_s15, %s580_s4 }
  0x19   : > { %v685_v5 = vor.u32 %v712_v4, %v684_v3  ;;  %v713_v7 = vld [vmem:[%s1136_s1 + $0x8] sm:$0x30]  ;;  %v700_v10 = vld [vmem:[%s1136_s1 + $0x18] sm:$0xf]  ;;  %v715_v11 = vld [vmem:[%s1136_s1 + $0x18] sm:$0x30]  ;;  %s584_s10 = scalar_lea.hbm %s1138_s3, %s581_s7 }
  0x1a   : > { %v319_v8 = vsel %vm250_vm0, %v693_v2, 0  ;;  %v679_v9 = vor.u32 %v713_v7, %v678_v6  ;;  %s721_s11 = smul.u32 108, %s180_s25  ;;  %v701_v13 = vor.u32 %v715_v11, %v700_v10  ;;  %vm243_vm1 = vcmask 97280   ;;  %v793_v50 = vld [vmem:[%s1137_s2] ss:$0 sm:$0xff]  ;;  %s588_s23 = sshll.u32 %s584_s10, 4  ;;  %s589_s23 = int_to_ptr.hbm [resolvable:$true] %s588_s23 }
  0x1b   : > { %328 = vmatpush.bf16.msra.mxu2 %v319_v8  ;;  %v283_v12 = vsel %vm250_vm0, %v685_v5, 0  ;;  %vm217_vm2 = vsmask.f32 7424  ;;  %s574_s16 = scalar_lea.sflag [#allocation3], %s177_s6  ;;  %s824_s24 = sshra.s32 %s589_s23, 4  ;;  %s825_s24 = int_to_ptr.hbm [resolvable:$true] %s824_s24 }
  0x1c   : > { %292 = vmatpush.bf16.msra.mxu1 %v283_v12  ;;  %v252_v14 = vsel %vm250_vm0, %v679_v9, 0  ;;  %s183_s28 = scalar_lea.vmem %s1135_s0, %s721_s11  ;;  %v374_v15 = vsel %vm250_vm0, %v701_v13, 0  ;;  %s178_s11 = scalar_lea.vmem [#allocation2], %s177_s6 }
  0x1d   : > { %261 = vmatpush.bf16.msra.mxu0 %v252_v14  ;;  %s191_s29 = scalar_lea.vmem %s183_s28, %s665_s20  ;;  %383 = vmatpush.bf16.msra.mxu3 %v374_v15  ;;  %s586_s20 = sshll.u32 %s178_s11, 4  ;;  %s587_s20 = int_to_ptr.vmem [resolvable:$true] %s586_s20 }
  0x1e   : > { %v711_v16 = vld [vmem:[%s191_s29 + $0x8] sm:$0xff]  ;;  %v710_v17 = vld [vmem:[%s191_s29] sm:$0xff]  ;;  %v720_v18 = vld [vmem:[%s191_s29 + $0x10] sm:$0xff]   ;;  %s826_s15 = scalar_lea.hbm %s825_s24, 1  ;;  %s830_s25 = scalar_lea.hbm %s1138_s3, 12 }
  0x1f   : > { %v350_v19 = vshll.u32 %v720_v18, 16  ;;  %694 = vmatmul.msk.bf16.vlgmr.msra.gmra.mxu2 %vm243_vm1, %v711_v16  ;;  %v221_v20 = vshll.u32 %v710_v17, 16  ;;  %686 = vmatmul.msk.bf16.vlgmr.msra.gmra.mxu1 %vm243_vm1, %v710_v17  ;;  %v219_v21 = vshrl.u32 %v710_v17, 16  ;;  %v226_v22 = vshll.u32 %v711_v16, 16  ;;  %v198_v24 = vld [vmem:[%s191_s29 + $0x18] sm:$0xf]  ;;  %p827_p13 = scmp.ne.s32.totalorder %s825_s24, %s826_s15  ;;  %p831_p2 = scmp.lt.s32.totalorder %s825_s24, %s1138_s3 }
  0x20   : > { %v230_v23 = vshrl.u32 %v711_v16, 16  ;;  %v718_v30 = vunpack.c.l.b16 %v720_v18  ;;  %v348_v31 = vunpack.c.l.b16 %v198_v24  ;;  %v354_v37 = vshrl.u32 %v720_v18, 16  ;;  %p832_p3 = scmp.lt.s32.totalorder %s830_s25, %s826_s15 }
  0x21   : > { %v223_v25 = vrot.slane %v221_v20, 1  ;;  %v228_v26 = vrot.slane %v226_v22, 1  ;;  %v352_v27 = vrot.slane %v350_v19, 1  ;;  %v487_v22 = vlaneseq  ;;  %p828_p0 = pnand %p827_p13, %p979_p5 }
  0x22   : > { %v216_v34 = vpack.c.b16 %v718_v30, %v718_v30  ;;  %v349_v35 = vpack.c.b16 %v348_v31, %v348_v31  ;;  %p833_p4 = por %p832_p3, %p831_p2 }
  0x23   : > { %v224_v28 = vor.u32 %v223_v25, %v219_v21  ;;  %v232_v29 = vor.u32 %v230_v23, %v228_v26  ;;  %v356_v40 = vor.u32 %v354_v37, %v352_v27  ;;  %p829_p1 = pneg %p828_p0 }
  0x24   : > { %v234_v36 = vshll.u32 %v216_v34, 16  ;;  %v358_v38 = vshll.u32 %v349_v35, 16 }
  0x25   : > { %v229_v32 = vsel %vm217_vm2, %v224_v28, %v228_v26  ;;  %v353_v33 = vsel %vm217_vm2, %v232_v29, %v352_v27  ;;  %p834_p6 = pnand %p833_p4, %p829_p1 }
  0x26   : > { %680 = vmatmul.msk.bf16.vlgmr.msra.gmra.mxu0 %vm243_vm1, %v229_v32  ;;  %702 = vmatmul.msk.bf16.vlgmr.msra.gmra.mxu3 %vm243_vm1, %v353_v33  ;;  %v236_v39 = vrot.slane %v234_v36, 1  ;;  %v360_v41 = vrot.slane %v358_v38, 1 }
  0x28   : > { %v237_v42 = vsel %vm217_vm2, %v232_v29, %v236_v39  ;;  %v361_v43 = vsel %vm217_vm2, %v356_v40, %v360_v41  ;;  %v488_v29 = vshrl.u32 %v487_v22, 7 }
  0x2a   : > { %v489_v34 = vadd.s32 8, %v488_v29 }
  0x2f   : > { %695 = vmatmul.msk.bf16.gmra.mxu2 %vm243_vm1, %v720_v18  ;;  %687 = vmatmul.msk.bf16.gmra.mxu1 %vm243_vm1, %v711_v16 }
  0x36   : > { %681 = vmatmul.msk.bf16.gmra.mxu0 %vm243_vm1, %v237_v42  ;;  %703 = vmatmul.msk.bf16.gmra.mxu3 %vm243_vm1, %v361_v43  ;;  %v503_v43 = vand.u32 15, %v489_v34  ;;  %vm556_vm1 = vcmask 130048  }
  0x38   : > { %vm1078_vm14 = vcmp.lt.s32.totalorder %v503_v43, 12 }
  0x9c   : > { %v294_v44 = vpop.f32.mrf.mxu1 }
  0xa2   : > { %v330_v45 = vpop.f32.mrf.mxu2 }
  0xa3   : > { %v263_v46 = vpop.f32.mrf.mxu0 }
  0xa4   : > { %v295_v47 = vadd.f32 %v294_v44, %v263_v46  ;;  %v296_v49 = vpop.f32.mrf.mxu1 }
  0xa6   : > { %v340_v48 = vadd.f32 %v330_v45, %v295_v47 }
  0xa9   : > { %v385_v51 = vpop.f32.mrf.mxu3 }
  0xaa   : > { %v395_v52 = vadd.f32 %v385_v51, %v340_v48  ;;  %v332_v53 = vpop.f32.mrf.mxu2 }
  0xab   : > { %v265_v54 = vpop.f32.mrf.mxu0 }
  0xac   : > { %v1046_v55 = vadd.f32 %v793_v50, %v395_v52  ;;  %v297_v56 = vadd.f32 %v296_v49, %v265_v54  ;;  %v299_v59 = vpop.f32.mrf.mxu1 }
  0xae   : > { %v704_v57 = vmul.f32 -1.442695, %v1046_v55  ;;  %v341_v58 = vadd.f32 %v332_v53, %v297_v56 }
  0xb0   : > { %794 = vpow2.f32 %v704_v57 }
  0xb1   : > { %v387_v60 = vpop.f32.mrf.mxu3 }
  0xb2   : > { %v396_v61 = vadd.f32 %v387_v60, %v341_v58  ;;  %v335_v1 = vpop.f32.mrf.mxu2 }
  0xb3   : > { %v268_v62 = vpop.f32.mrf.mxu0 }
  0xb4   : > { %v1049_v63 = vadd.f32 %v793_v50, %v396_v61  ;;  %v300_v0 = vadd.f32 %v299_v59, %v268_v62  ;;  %v301_v8 = vpop.f32.mrf.mxu1 }
  0xb6   : > { %v705_v2 = vmul.f32 -1.442695, %v1049_v63  ;;  %v342_v3 = vadd.f32 %v335_v1, %v300_v0  ;;  %v795_v4 = vpop.eup %794  ;;  %v491_v1 = vadd.s32 24, %v488_v29 }
  0xb7   : > { %v1052_v6 = vadd.f32 1.0, %v795_v4 }
  0xb8   : > { %796 = vpow2.f32 %v705_v2 }
  0xb9   : > { %v390_v5 = vpop.f32.mrf.mxu3  ;;  %798 = vrcp.f32 %v1052_v6  ;;  %v434_v46 = vand.u32 2147483648, %v1052_v6  ;;  %vm428_vm9 = vweird.f32 %v1052_v6 }
  0xba   : > { %v397_v7 = vadd.f32 %v390_v5, %v342_v3  ;;  %v337_v15 = vpop.f32.mrf.mxu2 }
  0xbb   : > { %v270_v9 = vpop.f32.mrf.mxu0  ;;  %v435_v58 = vor.u32 1.1754944e-38, %v434_v46 }
  0xbc   : > { %v1054_v10 = vadd.f32 %v793_v50, %v397_v7  ;;  %v302_v11 = vadd.f32 %v301_v8, %v270_v9 }
  0xbe   : > { %v797_v12 = vpop.eup %796  ;;  %v706_v13 = vmul.f32 -1.442695, %v1054_v10  ;;  %v343_v16 = vadd.f32 %v337_v15, %v302_v11  ;;  %v517_v11 = vand.u32 15, %v491_v1 }
  0xbf   : > { %v420_v14 = vadd.f32 1.0, %v797_v12  ;;  %v799_v19 = vpop.eup %798 }
  0xc0   : > { %800 = vpow2.f32 %v706_v13  ;;  %v424_v25 = vmul.f32 %v799_v19, %v1052_v6  ;;  %vm429_vm6 = vweird.f32 %v799_v19 }
  0xc1   : > { %802 = vrcp.f32 %v420_v14  ;;  %v392_v17 = vpop.f32.mrf.mxu3  ;;  %v449_v37 = vand.u32 2147483648, %v420_v14  ;;  %vm443_vm4 = vweird.f32 %v420_v14  ;;  %v447_v39 = vand.u32 2147483647, %v420_v14  ;;  %vm1071_vm10 = vmor %vm428_vm9, %vm429_vm6 }
  0xc2   : > { %v398_v18 = vadd.f32 %v392_v17, %v343_v16  ;;  %v425_v30 = vsub.f32 1.0, %v424_v25  ;;  %vm571_vm6 = vcmask 122880  }
  0xc3   : > { %v450_v47 = vor.u32 1.1754944e-38, %v449_v37  ;;  %vm448_vm7 = vcmp.eq.f32.partialorder %v447_v39, 8.507059e+37 }
  0xc4   : > { %v1058_v20 = vadd.f32 %v793_v50, %v398_v18  ;;  %v426_v36 = vmul.f32 %v799_v19, %v425_v30  ;;  %v432_v50 = vand.u32 2147483647, %v1052_v6 }
  0xc6   : > { %v801_v21 = vpop.eup %800  ;;  %v707_v23 = vmul.f32 -1.442695, %v1058_v20  ;;  %v427_v45 = vadd.f32 %v799_v19, %v426_v36  ;;  %vm433_vm13 = vcmp.eq.f32.partialorder %v432_v50, 8.507059e+37 }
  0xc7   : > { %v803_v24 = vpop.eup %802  ;;  %v421_v26 = vadd.f32 1.0, %v801_v21 }
  0xc8   : > { %v439_v27 = vmul.f32 %v803_v24, %v420_v14  ;;  %804 = vpow2.f32 %v707_v23  ;;  %vm444_vm3 = vweird.f32 %v803_v24  ;;  %v431_v57 = vsel %vm1071_vm10, %v799_v19, %v427_v45 }
  0xc9   : > { %806 = vrcp.f32 %v421_v26  ;;  %vm1062_vm5 = vmor %vm443_vm4, %vm444_vm3  ;;  %v464_v49 = vand.u32 2147483648, %v421_v26  ;;  %v462_v52 = vand.u32 2147483647, %v421_v26  ;;  %vm458_vm11 = vweird.f32 %v421_v26 }
  0xca   : > { %v440_v28 = vsub.f32 1.0, %v439_v27  ;;  %v436_v2 = vsel %vm433_vm13, %v435_v58, %v431_v57 }
  0xcb   : > { %v465_v61 = vor.u32 1.1754944e-38, %v464_v49  ;;  %vm463_vm15 = vcmp.eq.f32.partialorder %v462_v52, 8.507059e+37  ;;  %v483_v8 = vmul.f32 %v436_v2, %v1046_v55 }
  0xcc   : > { %v441_v31 = vmul.f32 %v803_v24, %v440_v28 }
  0xcd   : > { %v557_v16 = vsel %vm556_vm1, %v483_v8, 0.0 }
  0xce   : > { %v805_v32 = vpop.eup %804  ;;  %v442_v33 = vadd.f32 %v803_v24, %v441_v31 }
  0xcf   : > { %v807_v35 = vpop.eup %806  ;;  %v422_v38 = vadd.f32 1.0, %v805_v32 }
  0xd0   : > { %v454_v40 = vmul.f32 %v807_v35, %v421_v26  ;;  %v446_v42 = vsel %vm1062_vm5, %v803_v24, %v442_v33  ;;  %vm459_vm8 = vweird.f32 %v807_v35  ;;  %vm543_vm5 = vcmp.lt.s32.totalorder %v517_v11, 12 }
  0xd1   : > { %808 = vrcp.f32 %v422_v38  ;;  %v451_v51 = vsel %vm448_vm7, %v450_v47, %v446_v42  ;;  %vm460_vm12 = vmor %vm458_vm11, %vm459_vm8  ;;  %v479_v5 = vand.u32 2147483648, %v422_v38  ;;  %vm473_vm2 = vweird.f32 %v422_v38 }
  0xd2   : > { %v455_v44 = vsub.f32 1.0, %v454_v40  ;;  %v484_v59 = vmul.f32 %v451_v51, %v1049_v63  ;;  %v477_v63 = vand.u32 2147483647, %v422_v38 }
  0xd3   : > { %v480_v14 = vor.u32 1.1754944e-38, %v479_v5 }
  0xd4   : > { %v456_v48 = vmul.f32 %v807_v35, %v455_v44  ;;  %v553_v6 = vsel %vm1078_vm14, %v484_v59, 0.0  ;;  %vm478_vm4 = vcmp.eq.f32.partialorder %v477_v63, 8.507059e+37 }
  0xd5   : > { %v558_v13 = vsel %vm556_vm1, %v553_v6, 0.0 }
  0xd6   : > { %v457_v54 = vadd.f32 %v807_v35, %v456_v48 }
  0xd7   : > { %v809_v56 = vpop.eup %808 }
  0xd8   : > { %v461_v60 = vsel %vm460_vm12, %v807_v35, %v457_v54  ;;  %v469_v62 = vmul.f32 %v809_v56, %v422_v38  ;;  %vm474_vm0 = vweird.f32 %v809_v56 }
  0xd9   : > { %v466_v3 = vsel %vm463_vm15, %v465_v61, %v461_v60  ;;  %vm475_vm3 = vmor %vm473_vm2, %vm474_vm0 }
  0xda   : > { %v470_v4 = vsub.f32 1.0, %v469_v62  ;;  %v485_v9 = vmul.f32 %v466_v3, %v1054_v10  ;;  %v559_v10 = vadd.f32 %v558_v13, %v557_v16 }
  0xdc   : > { %v471_v7 = vmul.f32 %v809_v56, %v470_v4  ;;  %v560_v17 = vsel %vm556_vm1, %v485_v9, 0.0 }
  0xdd   : > { %v561_v19 = vadd.f32 %v560_v17, %v559_v10 }
  0xde   : > { %v472_v12 = vadd.f32 %v809_v56, %v471_v7 }
  0xe0   : > { %v476_v15 = vsel %vm475_vm3, %v809_v56, %v472_v12 }
  0xe1   : > { %v481_v55 = vsel %vm478_vm4, %v480_v14, %v476_v15 }
  0xe2   : > { %v486_v18 = vmul.f32 %v481_v55, %v1058_v20 }
  0xe4   : > { %v555_v21 = vsel %vm543_vm5, %v486_v18, 0.0 }
  0xe5   : > { %v562_v22 = vsel %vm556_vm1, %v555_v21, 0.0 }
  0xe6   : > { %v563_v23 = vadd.f32 %v562_v22, %v561_v19 }
  0xe8   : > { %v564_v24 = vrot.slane %v563_v23, 4 }
  0xea   : > { %v565_v25 = vadd.f32 %v564_v24, %v563_v23 }
  0xec   : > { %v566_v26 = vrot.slane %v565_v25, 2 }
  0xee   : > { %v567_v27 = vadd.f32 %v566_v26, %v565_v25 }
  0xf0   : > { %v568_v28 = vrot.slane %v567_v27, 1 }
  0xf2   : > { %v569_v20 = vadd.f32 %v568_v28, %v567_v27 }
  0xf4   : > { %v570_v29 = vmul.f32 0.041666668, %v569_v20 }
  0xf6   : > { %572 = vst.msk [vmem:[%s178_s11] sm:$0x1] %vm571_vm6, %v570_v29 }
  0xf7   : > { %837 = shalt.err (!%p834_p6)
}
  0xf8   : > { %722 = dma.vmem_to_hbm [thread:$0]  (%p979_p5), %s587_s20, 16, %s589_s23, %s574_s16  }
  0xf9 PF: > { %p728_p8 = scmp.ge.s32.totalorder %s904_s19, 2  ;;  %s600_s6 = sand.u32 1, %s876_s12  }
  0xfa   : > { %s601_s7 = scalar_lea.sflag [#allocation3], %s600_s6 }
  0xfb   : > { %p725_p9 = pnand %p728_p8, %p985_p7 }
  0xfd   : > { %p726_p10 = pneg %p725_p9 }
  0xff   : > { %871 = dma.done.wait (%p726_p10), %s601_s7, 16  }
 0x100   : > { %873 = vsyncadd (%p726_p10), %s601_s7, 4294967280  ;;  %s16_s19 = sadd.s32 1, %s904_s19   ;;  %s1147_s12 = smov %s880_s13 }
 0x101   : > { %p13_p11 = scmp.ge.s32.totalorder %s16_s19, 14   ;;  %s1148_s13 = smov %s884_s14 }
 0x102   : > { %s1149_s14 = smov %s995_s5  ;;  %s1150_s15 = smov %s896_s17 }
 0x103   : > { %s1151_s16 = smov %s900_s18  ;;  %s1152_s17 = smov %s1155_s21 }
 0x104   : > { %s1153_s18 = smov %s1159_s22  ;;  %15 = sbr.rel (!%p13_p11) target bundleno = 5 (0x5), region = 71 }
 0x109   :  { %606 = vsyncpa [#allocation3], 1 }
 0x10a   :  { %608 = vsyncpa [#allocation3 + $0x1], 1 }

</bundles_post_ra>
